<compile_context>
chip_gen: v6e
topology: v6e:2x2x1
jax: 0.10.0
libtpu: 0.0.40
codegen_flags: <defaults>
</compile_context>

<pallas_src>
import functools

import jax
import jax.numpy as jnp
from jax.experimental import pallas as pl
from jax.experimental.pallas import tpu as pltpu


def _gumbel_softmax_kernel(x_ref, w_ref, b_ref, gg_ref, sel_ref, u_ref,
                           sm_ref, sample_ref, *, tau):
    # Fused linear: logits[b, q*n_dist + d]  (lane-dense, F last)
    # TODO(synk): for large In/F on v6e/v7x, cast x/w to bf16 for the MXU dot (keep f32
    # accumulation); kept f32 here so the small-shape test matches the f32 reference.
    logits = jnp.dot(x_ref[...], w_ref[...],
                     preferred_element_type=jnp.float32) + b_ref[...]

    gg = gg_ref[...]  # [F, F] block-diagonal ones: per-group sum broadcast back to F lanes

    # Softmax over each contiguous group of n_dist lanes (row max for stability;
    # the shift cancels within each group, so this is exactly the per-group softmax).
    m = jnp.max(logits, axis=-1, keepdims=True)
    e = jnp.exp(logits - m)
    denom = jnp.dot(e, gg, preferred_element_type=jnp.float32)
    sm_ref[...] = e / denom

    # Gumbel noise + softmax((logits + g) / tau) over the same groups.
    g = -jnp.log(-jnp.log(u_ref[...] + 1e-8) + 1e-8)
    yl = (logits + g) / tau
    m2 = jnp.max(yl, axis=-1, keepdims=True)
    e2 = jnp.exp(yl - m2)
    denom2 = jnp.dot(e2, gg, preferred_element_type=jnp.float32)
    y = e2 / denom2

    # sample[:, j] = mean_i y[:, i*out_f + j]   (the .view(-1, n_dist, out_f).mean(1))
    # sel is the [F, out_f] 0/1 selection matrix already scaled by 1/n_dist.
    sample_ref[...] = jnp.dot(y, sel_ref[...], preferred_element_type=jnp.float32)


def gumbel_softmax(x, w, b, u, *, n_distributions, out_features, tau=1.0, tb=512):
    """x: [B, In] f32; w: [In, F] f32 (transposed torch weight); b: [1, F] f32;
    u: [B, F] uniform noise (the torch.rand draw, row-major flattened).
    Returns (sample [B, out_features], softmax [B*out_features, n_distributions])."""
    B, in_features = x.shape
    F = n_distributions * out_features
    assert w.shape == (in_features, F) and b.shape == (1, F) and u.shape == (B, F)

    k = jnp.arange(F, dtype=jnp.int32)
    # Block-diagonal ones matrix: group-sum + broadcast back, all in one lane-dense matmul.
    gg = (k[:, None] // n_distributions == k[None, :] // n_distributions).astype(jnp.float32)
    # Interleaved-mean selection matrix, pre-scaled by 1/n_distributions.
    sel = (k[:, None] % out_features ==
           jnp.arange(out_features, dtype=jnp.int32)[None, :]).astype(jnp.float32)
    sel = sel / n_distributions

    tb = min(tb, B)
    grid = (pl.cdiv(B, tb),)

    flops = 2 * B * in_features * F + 2 * 2 * B * F * F + 2 * B * F * out_features
    bytes_accessed = 4 * (B * in_features + in_features * F + F + F * F
                          + F * out_features + B * F          # inputs
                          + B * F + B * out_features)         # outputs

    sm_flat, sample = pl.pallas_call(
        functools.partial(_gumbel_softmax_kernel, tau=float(tau)),
        out_shape=(jax.ShapeDtypeStruct((B, F), jnp.float32),
                   jax.ShapeDtypeStruct((B, out_features), jnp.float32)),
        grid=grid,
        in_specs=[
            pl.BlockSpec((tb, in_features), lambda i: (i, 0)),    # x   (batch tiled)
            pl.BlockSpec((in_features, F), lambda i: (0, 0)),     # W   (resident)
            pl.BlockSpec((1, F), lambda i: (0, 0)),               # b   (resident)
            pl.BlockSpec((F, F), lambda i: (0, 0)),               # gg  (resident)
            pl.BlockSpec((F, out_features), lambda i: (0, 0)),    # sel (resident)
            pl.BlockSpec((tb, F), lambda i: (i, 0)),              # uniform noise
        ],
        out_specs=(pl.BlockSpec((tb, F), lambda i: (i, 0)),
                   pl.BlockSpec((tb, out_features), lambda i: (i, 0))),
        compiler_params=pltpu.CompilerParams(dimension_semantics=("parallel",)),
        cost_estimate=pl.CostEstimate(flops=int(flops),
                                      transcendentals=int(4 * B * F),
                                      bytes_accessed=int(bytes_accessed)),
    )(x, w, b, gg, sel, u)

    # Return the softmax in the PyTorch [(B*out_features), n_distributions] view.
    softmax = sm_flat.reshape(B * out_features, n_distributions)
    return sample, softmax


def _reference(x, w, b, u, n_dist, out_f, tau=1.0):
    B = x.shape[0]
    logits_full = x @ w + b                          # [B, F]
    logits = logits_full.reshape(-1, n_dist)         # [B*out_f, n_dist]
    softmax = jax.nn.softmax(logits, axis=-1)
    g = -jnp.log(-jnp.log(u.reshape(-1, n_dist) + 1e-8) + 1e-8)
    y = jax.nn.softmax((logits + g) / tau, axis=-1)
    sample = y.reshape(B, n_dist, out_f).mean(axis=1)
    return sample, softmax


if __name__ == "__main__":
    B, IN_F, OUT_F, N_DIST = 8, 32, 16, 8            # F = 128 -> lane-dense tiles
    TAU = 1.0
    F = N_DIST * OUT_F

    key = jax.random.PRNGKey(0)
    k = jax.random.split(key, 4)

    # Deterministic PyTorch-Linear-style parameter init.
    bound = 1.0 / (IN_F ** 0.5)
    w = jax.random.uniform(k[0], (IN_F, F), jnp.float32, -bound, bound)
    b = jax.random.uniform(k[1], (1, F), jnp.float32, -bound, bound)

    x = jax.random.normal(k[2], (B, IN_F), jnp.float32)
    # torch.rand equivalent, drawn outside the kernel for determinism.
    u = jax.random.uniform(k[3], (B, F), jnp.float32)

    sample, softmax = jax.block_until_ready(
        gumbel_softmax(x, w, b, u, n_distributions=N_DIST,
                       out_features=OUT_F, tau=TAU))

    ref_sample, ref_softmax = _reference(x, w, b, u, N_DIST, OUT_F, TAU)

    assert sample.shape == (B, OUT_F)
    assert softmax.shape == (B * OUT_F, N_DIST)
    assert jnp.allclose(sample, ref_sample, atol=1e-4, rtol=1e-4)
    assert jnp.allclose(softmax, ref_softmax, atol=1e-4, rtol=1e-4)

    print("KERNEL_OK")
</pallas_src>

<mosaic_0001>
module attributes {stable_mosaic.version = 11 : i64} {
  func.func @_gumbel_softmax_kernel(%arg0: i32, %arg1: memref<8x32xf32, #tpu.memory_space<vmem>>, %arg2: memref<32x128xf32, #tpu.memory_space<vmem>>, %arg3: memref<1x128xf32, #tpu.memory_space<vmem>>, %arg4: memref<128x128xf32, #tpu.memory_space<vmem>>, %arg5: memref<128x16xf32, #tpu.memory_space<vmem>>, %arg6: memref<8x128xf32, #tpu.memory_space<vmem>>, %arg7: memref<8x128xf32, #tpu.memory_space<vmem>>, %arg8: memref<8x16xf32, #tpu.memory_space<vmem>>) attributes {dimension_semantics = [#tpu.dimension_semantics<parallel>], iteration_bounds = array<i64: 1>, scalar_prefetch = 0 : i64, scratch_operands = 0 : i64, tpu.core_type = #tpu.core_type<tc>, window_params = [{transform_indices = @transform_0, window_bounds = array<i64: 8, 32>}, {pipeline_mode = #tpu.pipeline_mode<synchronous>, transform_indices = @transform_1, window_bounds = array<i64: 32, 128>}, {pipeline_mode = #tpu.pipeline_mode<synchronous>, transform_indices = @transform_2, window_bounds = array<i64: 1, 128>}, {pipeline_mode = #tpu.pipeline_mode<synchronous>, transform_indices = @transform_3, window_bounds = array<i64: 128, 128>}, {pipeline_mode = #tpu.pipeline_mode<synchronous>, transform_indices = @transform_4, window_bounds = array<i64: 128, 16>}, {transform_indices = @transform_5, window_bounds = array<i64: 8, 128>}, {transform_indices = @transform_6, window_bounds = array<i64: 8, 128>}, {transform_indices = @transform_7, window_bounds = array<i64: 8, 16>}]} {
    %c0 = arith.constant 0 : index
    %c0_0 = arith.constant 0 : index
    %0 = vector.load %arg1[%c0, %c0_0] : memref<8x32xf32, #tpu.memory_space<vmem>>, vector<8x32xf32>
    %c0_1 = arith.constant 0 : index
    %c0_2 = arith.constant 0 : index
    %1 = vector.load %arg2[%c0_1, %c0_2] : memref<32x128xf32, #tpu.memory_space<vmem>>, vector<32x128xf32>
    %cst = arith.constant dense<0.000000e+00> : vector<8x128xf32>
    %2 = tpu.matmul %0, %1, %cst {dimension_numbers = #tpu.dot_dimension_numbers<[1], [0], [0], [1], [0, 0, 1, 1], [], []>} : vector<8x32xf32>, vector<32x128xf32>, vector<8x128xf32> -> vector<8x128xf32>
    %c0_3 = arith.constant 0 : index
    %c0_4 = arith.constant 0 : index
    %3 = vector.load %arg3[%c0_3, %c0_4] : memref<1x128xf32, #tpu.memory_space<vmem>>, vector<1x128xf32>
    %4 = vector.broadcast %3 : vector<1x128xf32> to vector<8x128xf32>
    %5 = arith.addf %2, %4 : vector<8x128xf32>
    %c0_5 = arith.constant 0 : index
    %c0_6 = arith.constant 0 : index
    %6 = vector.load %arg4[%c0_5, %c0_6] : memref<128x128xf32, #tpu.memory_space<vmem>>, vector<128x128xf32>
    %cst_7 = arith.constant dense<0xFF800000> : vector<8xf32>
    %7 = vector.multi_reduction <maximumf>, %5, %cst_7 [1] : vector<8x128xf32> to vector<8xf32>
    %8 = vector.shape_cast %7 : vector<8xf32> to vector<8x1xf32>
    %9 = vector.broadcast %8 : vector<8x1xf32> to vector<8x128xf32>
    %10 = arith.subf %5, %9 : vector<8x128xf32>
    %11 = math.exp %10 : vector<8x128xf32>
    %cst_8 = arith.constant dense<0.000000e+00> : vector<8x128xf32>
    %12 = tpu.matmul %11, %6, %cst_8 {dimension_numbers = #tpu.dot_dimension_numbers<[1], [0], [0], [1], [0, 0, 1, 1], [], []>} : vector<8x128xf32>, vector<128x128xf32>, vector<8x128xf32> -> vector<8x128xf32>
    %13 = arith.divf %11, %12 : vector<8x128xf32>
    %c0_9 = arith.constant 0 : index
    %c0_10 = arith.constant 0 : index
    %14 = vector.load %arg7[%c0_9, %c0_10] : memref<8x128xf32, #tpu.memory_space<vmem>>, vector<8x128xf32>
    tpu.vector_store %arg7[%c0_9, %c0_10], %13 {strides = array<i32>} : memref<8x128xf32, #tpu.memory_space<vmem>>, vector<8x128xf32>,
    %c0_11 = arith.constant 0 : index
    %c0_12 = arith.constant 0 : index
    %15 = vector.load %arg6[%c0_11, %c0_12] : memref<8x128xf32, #tpu.memory_space<vmem>>, vector<8x128xf32>
    %cst_13 = arith.constant 9.99999993E-9 : f32
    %16 = vector.broadcast %cst_13 : f32 to vector<8x128xf32>
    %17 = arith.addf %15, %16 : vector<8x128xf32>
    %18 = math.log %17 : vector<8x128xf32>
    %cst_14 = arith.constant 0.000000e+00 : f32
    %19 = vector.broadcast %cst_14 : f32 to vector<8x128xf32>
    %20 = arith.subf %19, %18 : vector<8x128xf32>
    %cst_15 = arith.constant 9.99999993E-9 : f32
    %21 = vector.broadcast %cst_15 : f32 to vector<8x128xf32>
    %22 = arith.addf %20, %21 : vector<8x128xf32>
    %23 = math.log %22 : vector<8x128xf32>
    %cst_16 = arith.constant 0.000000e+00 : f32
    %24 = vector.broadcast %cst_16 : f32 to vector<8x128xf32>
    %25 = arith.subf %24, %23 : vector<8x128xf32>
    %26 = arith.addf %5, %25 : vector<8x128xf32>
    %cst_17 = arith.constant 1.000000e+00 : f32
    %27 = vector.broadcast %cst_17 : f32 to vector<8x128xf32>
    %28 = arith.divf %26, %27 : vector<8x128xf32>
    %cst_18 = arith.constant dense<0xFF800000> : vector<8xf32>
    %29 = vector.multi_reduction <maximumf>, %28, %cst_18 [1] : vector<8x128xf32> to vector<8xf32>
    %30 = vector.shape_cast %29 : vector<8xf32> to vector<8x1xf32>
    %31 = vector.broadcast %30 : vector<8x1xf32> to vector<8x128xf32>
    %32 = arith.subf %28, %31 : vector<8x128xf32>
    %33 = math.exp %32 : vector<8x128xf32>
    %cst_19 = arith.constant dense<0.000000e+00> : vector<8x128xf32>
    %34 = tpu.matmul %33, %6, %cst_19 {dimension_numbers = #tpu.dot_dimension_numbers<[1], [0], [0], [1], [0, 0, 1, 1], [], []>} : vector<8x128xf32>, vector<128x128xf32>, vector<8x128xf32> -> vector<8x128xf32>
    %35 = arith.divf %33, %34 : vector<8x128xf32>
    %c0_20 = arith.constant 0 : index
    %c0_21 = arith.constant 0 : index
    %36 = vector.load %arg5[%c0_20, %c0_21] : memref<128x16xf32, #tpu.memory_space<vmem>>, vector<128x16xf32>
    %cst_22 = arith.constant dense<0.000000e+00> : vector<8x16xf32>
    %37 = tpu.matmul %35, %36, %cst_22 {dimension_numbers = #tpu.dot_dimension_numbers<[1], [0], [0], [1], [0, 0, 1, 1], [], []>} : vector<8x128xf32>, vector<128x16xf32>, vector<8x16xf32> -> vector<8x16xf32>
    %c0_23 = arith.constant 0 : index
    %c0_24 = arith.constant 0 : index
    %38 = vector.load %arg8[%c0_23, %c0_24] : memref<8x16xf32, #tpu.memory_space<vmem>>, vector<8x16xf32>
    tpu.vector_store %arg8[%c0_23, %c0_24], %37 {strides = array<i32>} : memref<8x16xf32, #tpu.memory_space<vmem>>, vector<8x16xf32>,
    return
  }
  func.func @transform_0(%arg0: i32) -> (i32, i32) {
    %c0_i32 = arith.constant 0 : i32
    %c0_i32_0 = arith.constant 0 : i32
    return %arg0, %c0_i32 : i32, i32
  }
  func.func @transform_1(%arg0: i32) -> (i32, i32) {
    %c0_i32 = arith.constant 0 : i32
    %c0_i32_0 = arith.constant 0 : i32
    %c0_i32_1 = arith.constant 0 : i32
    return %c0_i32, %c0_i32_0 : i32, i32
  }
  func.func @transform_2(%arg0: i32) -> (i32, i32) {
    %c0_i32 = arith.constant 0 : i32
    %c0_i32_0 = arith.constant 0 : i32
    %c0_i32_1 = arith.constant 0 : i32
    return %c0_i32, %c0_i32_0 : i32, i32
  }
  func.func @transform_3(%arg0: i32) -> (i32, i32) {
    %c0_i32 = arith.constant 0 : i32
    %c0_i32_0 = arith.constant 0 : i32
    %c0_i32_1 = arith.constant 0 : i32
    return %c0_i32, %c0_i32_0 : i32, i32
  }
  func.func @transform_4(%arg0: i32) -> (i32, i32) {
    %c0_i32 = arith.constant 0 : i32
    %c0_i32_0 = arith.constant 0 : i32
    %c0_i32_1 = arith.constant 0 : i32
    return %c0_i32, %c0_i32_0 : i32, i32
  }
  func.func @transform_5(%arg0: i32) -> (i32, i32) {
    %c0_i32 = arith.constant 0 : i32
    %c0_i32_0 = arith.constant 0 : i32
    return %arg0, %c0_i32 : i32, i32
  }
  func.func @transform_6(%arg0: i32) -> (i32, i32) {
    %c0_i32 = arith.constant 0 : i32
    %c0_i32_0 = arith.constant 0 : i32
    return %arg0, %c0_i32 : i32, i32
  }
  func.func @transform_7(%arg0: i32) -> (i32, i32) {
    %c0_i32 = arith.constant 0 : i32
    %c0_i32_0 = arith.constant 0 : i32
    return %arg0, %c0_i32 : i32, i32
  }
}

</mosaic_0001>

<bundles_post_ra>
// kernel: tpu_custom_call.1
= control target key start
LH: loop header
LB: loop body
LE: loop exit
PB: predicated region body
PF: predicated region fallthrough
CT: control target
= control target key end

     0   :  { %13 = vsyncpa [#allocation3], 0  ;;  %s905_s0 = inlined_call_operand.vmem [shape: f32[8,32], index: 0, kind: input, shape index: {}]   ;;  %s906_s1 = inlined_call_operand.hbm [shape: f32[32,128], index: 1, kind: input, shape index: {}]   ;;  %s907_s2 = inlined_call_operand.vmem [shape: f32[1,128], index: 2, kind: input, shape index: {}]   ;;  %s908_s3 = inlined_call_operand.vmem [shape: f32[128,128], index: 3, kind: input, shape index: {}]   ;;  %s909_s4 = inlined_call_operand.vmem [shape: f32[128,16], index: 4, kind: input, shape index: {}]   ;;  %s910_s5 = inlined_call_operand.vmem [shape: f32[8,128], index: 5, kind: input, shape index: {}]   ;;  %s911_s6 = inlined_call_operand.hbm [shape: f32[8,128], index: 6, kind: output, shape index: {0}]   ;;  %s912_s7 = inlined_call_operand.hbm [shape: f32[8,16], index: 7, kind: output, shape index: {1}]  }
   0x1   :  { %14 = vsyncpa [#allocation4], 0 }
   0x2   :  { %15 = vsyncpa [#allocation7], 0  ;;  %s684_s24 = smov [#allocation2]  }
   0x3   :  { %s23_s25 = sshll.u32 %s684_s24, 4  ;;  %s24_s25 = int_to_ptr.vmem [resolvable:$true] %s23_s25 }
   0x4   :  { %s626_s26 = scalar_lea.vmem %s24_s25, 512  ;;  %p631_p1 = scmp.lt.s32.totalorder %s24_s25, %s24_s25 }
   0x5   :  { %p627_p0 = scmp.ne.s32.totalorder %s24_s25, %s626_s26  ;;  %p632_p2 = scmp.lt.s32.totalorder %s626_s26, %s626_s26 }
   0x7   :  { %p633_p3 = por %p632_p2, %p631_p1 }
   0x9   :  { %p634_p4 = pnand %p633_p3, %p627_p0 }
   0xb   :  { %637 = shalt.err (!%p634_p4)
}
   0xc   :  { %s685_s27 = smov 128   ;;  %s686_s28 = smov 8  }
   0xd   :  { %29 = dma.hbm_to_vmem [thread:$0]  %s906_s1, 512, %s24_s25, [#allocation3], %s685_s27, %s685_s27, %s686_s28  }
   0xe   :  { %678 = dma.done.wait [#allocation3], 512  }
   0xf   :  { %679 = vsyncadd [#allocation3], 4294966784  ;;  %v687_v0 = vmov 0.0   ;;  %vm688_vm0 = vmmov 0   ;;  %v45_v1 = vld [vmem:[#allocation2 + $0x18] sm:$0xff]  ;;  %v44_v2 = vld [vmem:[#allocation2 + $0x10] sm:$0xff] }
  0x10   :  { %483 = vmatprep.subr.mxu0 %v687_v0  ;;  %491 = vmatprep.mubr.msk.f32.mxu0 %vm688_vm0, %v687_v0  ;;  %v43_v3 = vld [vmem:[#allocation2 + $0x8] sm:$0xff]  ;;  %v42_v4 = vld [vmem:[#allocation2] sm:$0xff]  ;;  %vm53_vm1 = vcmask 261120   ;;  %v142_v6 = vld [vmem:[%s908_s3 + $0x78] sm:$0xff]  ;;  %s689_s20 = smov [#allocation5]  }
  0x11   :  { %494 = vmatprep.subr.mxu1 %v687_v0  ;;  %526 = vmatprep.mubr.msk.f32.mxu1 %vm688_vm0, %v687_v0  ;;  %v41_v5 = vld [vmem:[%s905_s0] sm:$0xff]  ;;  %v141_v7 = vld [vmem:[%s908_s3 + $0x70] sm:$0xff]  ;;  %v140_v8 = vld [vmem:[%s908_s3 + $0x68] sm:$0xff]  ;;  %s402_s21 = sshll.u32 %s689_s20, 4  ;;  %s403_s21 = int_to_ptr.vmem [resolvable:$true] %s402_s21 }
  0x12   :  { %484 = vmatpush3.msra.mxu0 %v45_v1  ;;  %495 = vmatpush3.msra.mxu1 %v142_v6  ;;  %v139_v9 = vld [vmem:[%s908_s3 + $0x60] sm:$0xff]  ;;  %v138_v10 = vld [vmem:[%s908_s3 + $0x58] sm:$0xff]  ;;  %v137_v11 = vld [vmem:[%s908_s3 + $0x50] sm:$0xff]  ;;  %p643_p6 = scmp.lt.s32.totalorder %s403_s21, %s403_s21 }
  0x13   :  { %485 = vmatprep.subr.mxu0 %v687_v0  ;;  %496 = vmatprep.subr.mxu1 %v687_v0  ;;  %v136_v12 = vld [vmem:[%s908_s3 + $0x48] sm:$0xff]  ;;  %v221_v13 = vld [vmem:[%s910_s5] sm:$0xff]  ;;  %v134_v28 = vld [vmem:[%s908_s3 + $0x38] sm:$0xff] }
  0x14   :  { %486 = vmatpush3.msra.mxu0 %v44_v2  ;;  %497 = vmatpush3.msra.mxu1 %v141_v7  ;;  %v222_v14 = vadd.f32 1e-08, %v221_v13  ;;  %v425_v21 = vld [vmem:[%s907_s2] ss:$0 sm:$0xff]  ;;  %v133_v29 = vld [vmem:[%s908_s3 + $0x30] sm:$0xff]  ;;  %v132_v30 = vld [vmem:[%s908_s3 + $0x28] sm:$0xff] }
  0x15   :  { %487 = vmatprep.subr.mxu0 %v687_v0  ;;  %498 = vmatprep.subr.mxu1 %v687_v0  ;;  %v135_v27 = vld [vmem:[%s908_s3 + $0x40] sm:$0xff]  ;;  %v130_v32 = vld [vmem:[%s908_s3 + $0x18] sm:$0xff]  ;;  %v129_v33 = vld [vmem:[%s908_s3 + $0x10] sm:$0xff] }
  0x16   :  { %488 = vmatpush3.msra.mxu0 %v43_v3  ;;  %499 = vmatpush3.msra.mxu1 %v140_v8  ;;  %606 = vlog2.f32 %v222_v14  ;;  %v131_v31 = vld [vmem:[%s908_s3 + $0x20] sm:$0xff]  ;;  %v128_v34 = vld [vmem:[%s908_s3 + $0x8] sm:$0xff]  ;;  %v323_v43 = vld [vmem:[%s909_s4 + $0x78] sm:$0xff] }
  0x17   :  { %489 = vmatprep.subr.mxu0 %v687_v0  ;;  %500 = vmatprep.subr.mxu1 %v687_v0  ;;  %v127_v35 = vld [vmem:[%s908_s3] sm:$0xff]  ;;  %v322_v45 = vld [vmem:[%s909_s4 + $0x70] sm:$0xff]  ;;  %v321_v46 = vld [vmem:[%s909_s4 + $0x68] sm:$0xff] }
  0x18   :  { %490 = vmatpush3.msra.mxu0 %v42_v4  ;;  %501 = vmatpush3.msra.mxu1 %v139_v9  ;;  %v320_v47 = vld [vmem:[%s909_s4 + $0x60] sm:$0xff]  ;;  %v319_v48 = vld [vmem:[%s909_s4 + $0x58] sm:$0xff]  ;;  %v318_v49 = vld [vmem:[%s909_s4 + $0x50] sm:$0xff] }
  0x19   :  { %492 = vmatmul.mubr.msk.f32.vlgmr.msra.gmra.mxu0 %vm53_vm1, %v41_v5  ;;  %529 = vmatprep.subr.mxu0 %v687_v0  ;;  %v317_v50 = vld [vmem:[%s909_s4 + $0x48] sm:$0xff]  ;;  %v316_v51 = vld [vmem:[%s909_s4 + $0x40] sm:$0xff]  ;;  %v315_v52 = vld [vmem:[%s909_s4 + $0x38] sm:$0xff] }
  0x1a   :  { %561 = vmatprep.mubr.msk.f32.mxu0 %vm688_vm0, %v687_v0  ;;  %530 = vmatpush3.msra.mxu0 %v142_v6  ;;  %v314_v53 = vld [vmem:[%s909_s4 + $0x30] sm:$0xff]  ;;  %v313_v54 = vld [vmem:[%s909_s4 + $0x28] sm:$0xff]  ;;  %v312_v55 = vld [vmem:[%s909_s4 + $0x20] sm:$0xff] }
  0x1b   :  { %531 = vmatprep.subr.mxu0 %v687_v0  ;;  %502 = vmatprep.subr.mxu1 %v687_v0  ;;  %v311_v56 = vld [vmem:[%s909_s4 + $0x18] sm:$0xff]  ;;  %v310_v57 = vld [vmem:[%s909_s4 + $0x10] sm:$0xff]  ;;  %v309_v58 = vld [vmem:[%s909_s4 + $0x8] sm:$0xff] }
  0x1c   :  { %532 = vmatpush3.msra.mxu0 %v141_v7  ;;  %503 = vmatpush3.msra.mxu1 %v138_v10  ;;  %v308_v59 = vld [vmem:[%s909_s4] sm:$0xff]  ;;  %s638_s4 = scalar_lea.vmem %s403_s21, 128 }
  0x1d   :  { %533 = vmatprep.subr.mxu0 %v687_v0  ;;  %504 = vmatprep.subr.mxu1 %v687_v0  ;;  %p639_p5 = scmp.ne.s32.totalorder %s403_s21, %s638_s4  ;;  %p644_p7 = scmp.lt.s32.totalorder %s638_s4, %s638_s4 }
  0x1e   :  { %534 = vmatpush3.msra.mxu0 %v140_v8  ;;  %505 = vmatpush3.msra.mxu1 %v137_v11 }
  0x1f   :  { %535 = vmatprep.subr.mxu0 %v687_v0  ;;  %506 = vmatprep.subr.mxu1 %v687_v0  ;;  %p645_p8 = por %p644_p7, %p643_p6 }
  0x20   :  { %536 = vmatpush3.msra.mxu0 %v139_v9  ;;  %507 = vmatpush3.msra.mxu1 %v136_v12 }
  0x21   :  { %537 = vmatprep.subr.mxu0 %v687_v0  ;;  %508 = vmatprep.subr.mxu1 %v687_v0  ;;  %p646_p9 = pnand %p645_p8, %p639_p5 }
  0x22   :  { %538 = vmatpush3.msra.mxu0 %v138_v10  ;;  %509 = vmatpush3.msra.mxu1 %v135_v27 }
  0x23   :  { %539 = vmatprep.subr.mxu0 %v687_v0  ;;  %v607_v15 = vpop.eup %606  ;;  %510 = vmatprep.subr.mxu1 %v687_v0 }
  0x24   :  { %540 = vmatpush3.msra.mxu0 %v137_v11  ;;  %v224_v16 = vmul.f32 0.6931472, %v607_v15  ;;  %511 = vmatpush3.msra.mxu1 %v134_v28 }
  0x25   :  { %541 = vmatprep.subr.mxu0 %v687_v0  ;;  %512 = vmatprep.subr.mxu1 %v687_v0 }
  0x26   :  { %542 = vmatpush3.msra.mxu0 %v136_v12  ;;  %v225_v17 = vsub.f32 0.0, %v224_v16  ;;  %513 = vmatpush3.msra.mxu1 %v133_v29 }
  0x27   :  { %543 = vmatprep.subr.mxu0 %v687_v0  ;;  %514 = vmatprep.subr.mxu1 %v687_v0 }
  0x28   :  { %v226_v18 = vadd.f32 1e-08, %v225_v17  ;;  %544 = vmatpush3.msra.mxu0 %v135_v27  ;;  %515 = vmatpush3.msra.mxu1 %v132_v30 }
  0x29   :  { %545 = vmatprep.subr.mxu0 %v687_v0  ;;  %516 = vmatprep.subr.mxu1 %v687_v0 }
  0x2a   :  { %608 = vlog2.f32 %v226_v18  ;;  %546 = vmatpush3.msra.mxu0 %v134_v28  ;;  %517 = vmatpush3.msra.mxu1 %v131_v31 }
  0x2b   :  { %547 = vmatprep.subr.mxu0 %v687_v0  ;;  %518 = vmatprep.subr.mxu1 %v687_v0 }
  0x2c   :  { %548 = vmatpush3.msra.mxu0 %v133_v29  ;;  %519 = vmatpush3.msra.mxu1 %v130_v32 }
  0x2d   :  { %549 = vmatprep.subr.mxu0 %v687_v0  ;;  %520 = vmatprep.subr.mxu1 %v687_v0 }
  0x2e   :  { %550 = vmatpush3.msra.mxu0 %v132_v30  ;;  %521 = vmatpush3.msra.mxu1 %v129_v33 }
  0x2f   :  { %551 = vmatprep.subr.mxu0 %v687_v0  ;;  %522 = vmatprep.subr.mxu1 %v687_v0 }
  0x30   :  { %552 = vmatpush3.msra.mxu0 %v131_v31  ;;  %523 = vmatpush3.msra.mxu1 %v128_v34 }
  0x31   :  { %553 = vmatprep.subr.mxu0 %v687_v0  ;;  %524 = vmatprep.subr.mxu1 %v687_v0 }
  0x32   :  { %554 = vmatpush3.msra.mxu0 %v130_v32  ;;  %525 = vmatpush3.msra.mxu1 %v127_v35 }
  0x33   :  { %555 = vmatprep.subr.mxu0 %v687_v0  ;;  %564 = vmatprep.subr.mxu1 %v687_v0 }
  0x34   :  { %556 = vmatpush3.msra.mxu0 %v129_v33 }
  0x35   :  { %557 = vmatprep.subr.mxu0 %v687_v0 }
  0x36   :  { %558 = vmatpush3.msra.mxu0 %v128_v34 }
  0x37   :  { %v609_v19 = vpop.eup %608  ;;  %559 = vmatprep.subr.mxu0 %v687_v0 }
  0x38   :  { %v228_v20 = vmul.f32 0.6931472, %v609_v19  ;;  %560 = vmatpush3.msra.mxu0 %v127_v35 }
  0x3a   :  { %v229_v22 = vsub.f32 0.0, %v228_v20 }
  0xd9   :  { %v123_v23 = vpop.f32.mrf.mxu0 }
  0xda   :  { %v124_v24 = vadd.f32 %v425_v21, %v123_v23 }
  0xdb   :  { %v493_v25 = vpop.f32.mrf.mxu0 }
  0xdc   :  { %v230_v26 = vadd.f32 %v229_v22, %v124_v24 }
  0xde   :  { %231 = vmax.xlane.f32.xlu0 %v230_v26 }
  0xe2   :  { %143 = vmax.xlane.f32.xlu0 %v124_v24 }
 0x167   :  { %v232_v36 = vpop.xlane.xlu0 %231 }
 0x168   :  { %v233_v37 = vsub.f32 %v230_v26, %v232_v36 }
 0x16a   :  { %v234_v38 = vmul.f32 1.442695, %v233_v37 }
 0x16b   :  { %v144_v39 = vpop.xlane.xlu0 %143 }
 0x16c   :  { %610 = vpow2.f32 %v234_v38  ;;  %v145_v40 = vsub.f32 %v124_v24, %v144_v39 }
 0x16e   :  { %v146_v41 = vmul.f32 1.442695, %v145_v40 }
 0x170   :  { %612 = vpow2.f32 %v146_v41 }
 0x179   :  { %v611_v42 = vpop.eup %610 }
 0x17a   :  { %562 = vmatmul.mubr.f32.vlgmr.msra.gmra.mxu0 %v611_v42 }
 0x17d   :  { %v613_v44 = vpop.eup %612 }
 0x17e   :  { %527 = vmatmul.mubr.f32.vlgmr.msra.gmra.mxu1 %v613_v44 }
 0x17f   :  { %565 = vmatpush3.msra.mxu1 %v323_v43  ;;  %596 = vmatprep.mubr.msk.f32.mxu1 %vm688_vm0, %v687_v0 }
 0x180   :  { %566 = vmatprep.subr.mxu1 %v687_v0 }
 0x181   :  { %567 = vmatpush3.msra.mxu1 %v322_v45 }
 0x182   :  { %568 = vmatprep.subr.mxu1 %v687_v0 }
 0x183   :  { %569 = vmatpush3.msra.mxu1 %v321_v46 }
 0x184   :  { %570 = vmatprep.subr.mxu1 %v687_v0 }
 0x185   :  { %571 = vmatpush3.msra.mxu1 %v320_v47 }
 0x186   :  { %572 = vmatprep.subr.mxu1 %v687_v0 }
 0x187   :  { %573 = vmatpush3.msra.mxu1 %v319_v48 }
 0x188   :  { %574 = vmatprep.subr.mxu1 %v687_v0 }
 0x189   :  { %575 = vmatpush3.msra.mxu1 %v318_v49 }
 0x18a   :  { %576 = vmatprep.subr.mxu1 %v687_v0 }
 0x18b   :  { %577 = vmatpush3.msra.mxu1 %v317_v50 }
 0x18c   :  { %578 = vmatprep.subr.mxu1 %v687_v0 }
 0x18d   :  { %579 = vmatpush3.msra.mxu1 %v316_v51 }
 0x18e   :  { %580 = vmatprep.subr.mxu1 %v687_v0 }
 0x18f   :  { %581 = vmatpush3.msra.mxu1 %v315_v52 }
 0x190   :  { %582 = vmatprep.subr.mxu1 %v687_v0 }
 0x191   :  { %583 = vmatpush3.msra.mxu1 %v314_v53 }
 0x192   :  { %584 = vmatprep.subr.mxu1 %v687_v0 }
 0x193   :  { %585 = vmatpush3.msra.mxu1 %v313_v54 }
 0x194   :  { %586 = vmatprep.subr.mxu1 %v687_v0 }
 0x195   :  { %587 = vmatpush3.msra.mxu1 %v312_v55 }
 0x196   :  { %588 = vmatprep.subr.mxu1 %v687_v0 }
 0x197   :  { %589 = vmatpush3.msra.mxu1 %v311_v56 }
 0x198   :  { %590 = vmatprep.subr.mxu1 %v687_v0 }
 0x199   :  { %591 = vmatpush3.msra.mxu1 %v310_v57 }
 0x19a   :  { %592 = vmatprep.subr.mxu1 %v687_v0 }
 0x19b   :  { %593 = vmatpush3.msra.mxu1 %v309_v58 }
 0x19c   :  { %594 = vmatprep.subr.mxu1 %v687_v0 }
 0x19d   :  { %595 = vmatpush3.msra.mxu1 %v308_v59 }
 0x23a   :  { %v302_v60 = vpop.f32.mrf.mxu0 }
 0x23b   :  { %614 = vrcp.f32 %v302_v60 }
 0x23c   :  { %v563_v61 = vpop.f32.mrf.mxu0 }
 0x23e   :  { %v214_v62 = vpop.f32.mrf.mxu1 }
 0x23f   :  { %616 = vrcp.f32 %v214_v62 }
 0x240   :  { %v528_v63 = vpop.f32.mrf.mxu1 }
 0x248   :  { %v615_v1 = vpop.eup %614 }
 0x249   :  { %v307_v2 = vmul.f32 %v615_v1, %v611_v42 }
 0x24b   :  { %597 = vmatmul.mubr.f32.vlgmr.msra.gmra.mxu1 %v307_v2 }
 0x24c   :  { %v617_v3 = vpop.eup %616 }
 0x24d   :  { %v219_v4 = vmul.f32 %v617_v3, %v613_v44 }
 0x24f   :  { %220 = vst [vmem:[#allocation5] sm:$0xff] %v219_v4 }
 0x250   :  { %649 = shalt.err (!%p646_p9)
}
 0x251   :  { %405 = dma.vmem_to_hbm [thread:$0]  %s403_s21, 128, %s911_s6, [#allocation4]   ;;  %vm394_vm2 = vcmask 130048  }
 0x252   :  { %s690_s24 = smov [#allocation6]  }
 0x253   :  { %s412_s25 = sshll.u32 %s690_s24, 4  ;;  %s413_s25 = int_to_ptr.vmem [resolvable:$true] %s412_s25 }
 0x254   :  { %s658_s5 = scalar_lea.vmem %s413_s25, 128  ;;  %p663_p11 = scmp.lt.s32.totalorder %s413_s25, %s413_s25 }
 0x255   :  { %p659_p10 = scmp.ne.s32.totalorder %s413_s25, %s658_s5  ;;  %p664_p12 = scmp.lt.s32.totalorder %s658_s5, %s658_s5 }
 0x257   :  { %p665_p13 = por %p664_p12, %p663_p11 }
 0x259   :  { %p666_p0 = pnand %p665_p13, %p659_p10 }
 0x30b   :  { %v390_v0 = vpop.f32.mrf.mxu1 }
 0x30c   :  { %395 = vst.msk [vmem:[#allocation6] sm:$0xff] %vm394_vm2, %v390_v0 }
 0x30d   :  { %v598_v5 = vpop.f32.mrf.mxu1 }
 0x30e   :  { %669 = shalt.err (!%p666_p0)
}
 0x30f   :  { %415 = dma.vmem_to_hbm [thread:$0]  %s413_s25, 128, %s912_s7, [#allocation7]  }
 0x310   :  { %680 = dma.done.wait [#allocation4], 128  }
 0x311   :  { %681 = vsyncadd [#allocation4], 4294967168 }
 0x312   :  { %682 = dma.done.wait [#allocation7], 128  }
 0x313   :  { %683 = vsyncadd [#allocation7], 4294967168 }
 0x314   :  { %422 = vsyncpa [#allocation3], 1 }
 0x315   :  { %423 = vsyncpa [#allocation4], 1 }
 0x316   :  { %424 = vsyncpa [#allocation7], 1 }

</bundles_post_ra>
